<compile_context>
chip_gen: v7x
topology: tpu7x:2x2x1
jax: 0.10.0
libtpu: 0.0.40
codegen_flags: <defaults>
</compile_context>

<pallas_src>
import functools

import jax
import jax.numpy as jnp
from jax import lax
from jax.experimental import pallas as pl
from jax.experimental.pallas import tpu as pltpu


def _ffn_kernel(h_ref, prev_ref, maa_k_ref, maa_r_ref,
                wk_ref, wr_ref, wv_ref, o_ref, acc_ref):
    """One (batch, time-tile, I-chunk) grid step of the RWKV6 channel-mix FFN.

    h_ref    : (1, TT, H)    current rows of `hidden`
    prev_ref : (1, 1, 1, H)  last row of previous time tile (zeros at t == 0)
    maa_*    : (1, H)        time-mix coefficients (f32)
    wk_ref   : (H, IC)       key.weight.T chunk       (compute dtype)
    wr_ref   : (H, H)        receptance.weight.T      (resident, compute dtype)
    wv_ref   : (IC, H)       value.weight.T chunk     (compute dtype)
    o_ref    : (1, TT, H)
    acc_ref  : (TT, H) f32   value accumulator across I chunks
    """
    i = pl.program_id(2)
    n_i = pl.num_programs(2)

    h = h_ref[0].astype(jnp.float32)                          # (TT, H)
    tt, hh = h.shape
    prev = prev_ref[...].reshape(1, hh).astype(jnp.float32)   # (1, H)

    # time_shift: shifted[j] = h[j-1]; shifted[0] = last row of the previous
    # tile (zeros at each batch start -- baked into `prev` by the wrapper).
    if tt > 1:
        rolled = pltpu.roll(h, shift=1, axis=0)               # rolled[j] = h[j-1]
        row0 = lax.broadcasted_iota(jnp.int32, (tt, 1), 0) == 0
        shifted = jnp.where(row0, prev, rolled)               # (TT, H)
    else:
        shifted = jnp.broadcast_to(prev, h.shape)
    delta = shifted - h                                       # (TT, H) f32

    cdt = wk_ref.dtype                                        # MXU operand dtype

    @pl.when(i == 0)
    def _():
        acc_ref[...] = jnp.zeros_like(acc_ref)

    # key chunk = relu(key_in @ Wk_t[:, chunk]) ** 2 ;  value += key @ Wv_t[chunk]
    key_in = h + delta * maa_k_ref[...].astype(jnp.float32)   # (TT, H)
    k = jnp.dot(key_in.astype(cdt), wk_ref[...],
                preferred_element_type=jnp.float32)           # (TT, IC)
    k = jnp.maximum(k, 0.0)
    k = k * k
    acc_ref[...] += jnp.dot(k.astype(cdt), wv_ref[...],
                            preferred_element_type=jnp.float32)  # (TT, H)

    @pl.when(i == n_i - 1)
    def _():
        rec_in = h + delta * maa_r_ref[...].astype(jnp.float32)
        r = jnp.dot(rec_in.astype(cdt), wr_ref[...],
                    preferred_element_type=jnp.float32)       # (TT, H)
        r = jax.nn.sigmoid(r)
        o_ref[0] = (r * acc_ref[...]).astype(o_ref.dtype)


def _round_up(x, m):
    return ((x + m - 1) // m) * m


def _pick_time_tile(T, target):
    """Number of time tiles and an 8-aligned tile size (pad T up; never 1)."""
    nt = max(1, -(-T // max(target, 8)))
    tt = _round_up(-(-T // nt), 8)
    return tt, nt


def _pick_i_tile(I, target):
    """I-chunk: a multiple of 128 dividing I (<= target), else I itself."""
    if I <= target:
        return I
    c = (min(target, I) // 128) * 128
    while c >= 128:
        if I % c == 0:
            return c
        c -= 128
    return I  # TODO(synk): pad I instead of falling back to full residency.


def _block_spec(shape, index_map, buffers=None):
    """BlockSpec with optional pipeline_mode=pl.Buffered(n) (graceful fallback)."""
    if buffers is not None and hasattr(pl, "Buffered"):
        try:
            return pl.BlockSpec(shape, index_map,
                                pipeline_mode=pl.Buffered(buffers))
        except TypeError:
            pass
    return pl.BlockSpec(shape, index_map)


def _vmem_capacity_bytes():
    try:
        info = pltpu.get_tpu_info()
        cap = getattr(info, "vmem_capacity_bytes", None)
        if cap:
            return int(cap)
    except Exception:
        pass
    return 128 * 1024 * 1024


def prepare_ffn_weights(w_key, w_receptance, w_value,
                        compute_dtype=jnp.bfloat16):
    """One-time weight transform (cache the result; do NOT redo per call):
    torch nn.Linear (out_features, in_features) -> MXU-natural (in, out) + cast.
    """
    return (jnp.asarray(w_key).T.astype(compute_dtype),        # (H, I)
            jnp.asarray(w_receptance).T.astype(compute_dtype),  # (H, H)
            jnp.asarray(w_value).T.astype(compute_dtype))       # (I, H)


def rwkv6_feed_forward(hidden, time_maa_k, time_maa_r, wk_t, wr_t, wv_t,
                       *, time_tile=256, i_tile=2048):
    """Forward pass of Rwkv6FeedForward with state=None.

    hidden:       (B, T, H)
    time_maa_k/r: (1, 1, H)
    wk_t:         (H, I)  = key.weight.T          (see prepare_ffn_weights)
    wr_t:         (H, H)  = receptance.weight.T
    wv_t:         (I, H)  = value.weight.T
    returns:      (B, T, H)
    """
    B, T, H = hidden.shape
    I = wk_t.shape[1]
    assert wk_t.shape == (H, I) and wr_t.shape == (H, H) and wv_t.shape == (I, H)

    TT, NT = _pick_time_tile(T, time_tile)
    T_pad = TT * NT
    hidden_p = hidden if T_pad == T else jnp.pad(
        hidden, ((0, 0), (0, T_pad - T), (0, 0)))

    IC = _pick_i_tile(I, i_tile)
    NI = I // IC

    # Per-tile boundary rows: boundary[b, t] = hidden[b, t*TT - 1] for t > 0,
    # zeros for t == 0 (batch start). Only B*NT rows; replaces a full (B, T, H)
    # `shifted` copy round-tripping HBM.
    zero_row = jnp.zeros((B, 1, H), hidden.dtype)
    if NT > 1:
        tails = hidden_p[:, TT - 1:T_pad - 1:TT, :]            # (B, NT-1, H)
        boundary = jnp.concatenate([zero_row, tails], axis=1)
    else:
        boundary = zero_row
    boundary = boundary.reshape(B, NT, 1, H)

    maa_k = time_maa_k.reshape(1, H).astype(jnp.float32)
    maa_r = time_maa_r.reshape(1, H).astype(jnp.float32)

    act_item = jnp.dtype(hidden.dtype).itemsize
    w_item = jnp.dtype(wk_t.dtype).itemsize
    w_bufs = 1 if NI == 1 else 2          # buffer count for Wk/Wv chunks

    # Honest VMEM budget (counting each input at its buffer count).
    needed = (
        2 * 2 * TT * H * act_item         # hidden in + out tiles, double-buffered
        + 2 * 2 * H * act_item            # boundary rows
        + 2 * H * 4                       # maa_k + maa_r (single-buffered)
        + H * H * w_item                  # Wr (resident, single-buffered)
        + 2 * w_bufs * H * IC * w_item    # Wk + Wv chunks
        + TT * H * 4                      # f32 value accumulator scratch
        + TT * (IC + 4 * H) * 4           # f32 intermediates headroom
    )
    vmem_limit = int(min(max(int(needed * 1.4), 32 * 1024 * 1024),
                         int(_vmem_capacity_bytes() * 0.85)))

    w_read_mult = 1 if NI == 1 else B * NT   # chunked Wk/Wv re-streamed per tile
    cost = pl.CostEstimate(
        flops=2 * B * T_pad * (2 * H * I + H * H),
        transcendentals=B * T_pad * H,                         # sigmoid
        bytes_accessed=(2 * B * T_pad * H * act_item           # hidden in + out
                        + B * NT * H * act_item                # boundary rows
                        + w_read_mult * 2 * H * I * w_item     # Wk + Wv streams
                        + H * H * w_item + 2 * H * 4),
    )

    out = pl.pallas_call(
        _ffn_kernel,
        out_shape=jax.ShapeDtypeStruct((B, T_pad, H), hidden.dtype),
        grid=(B, NT, NI),
        in_specs=[
            pl.BlockSpec((1, TT, H), lambda b, t, i: (b, t, 0)),        # hidden
            pl.BlockSpec((1, 1, 1, H), lambda b, t, i: (b, t, 0, 0)),   # prev row
            _block_spec((1, H), lambda b, t, i: (0, 0), buffers=1),     # maa_k
            _block_spec((1, H), lambda b, t, i: (0, 0), buffers=1),     # maa_r
            _block_spec((H, IC), lambda b, t, i: (0, i),
                        buffers=1 if NI == 1 else None),                # Wk.T chunk
            _block_spec((H, H), lambda b, t, i: (0, 0), buffers=1),     # Wr.T
            _block_spec((IC, H), lambda b, t, i: (i, 0),
                        buffers=1 if NI == 1 else None),                # Wv.T chunk
        ],
        out_specs=pl.BlockSpec((1, TT, H), lambda b, t, i: (b, t, 0)),
        scratch_shapes=[pltpu.VMEM((TT, H), jnp.float32)],
        compiler_params=pltpu.CompilerParams(
            dimension_semantics=("parallel", "parallel", "arbitrary"),
            vmem_limit_bytes=vmem_limit),
        cost_estimate=cost,
    )(hidden_p, boundary, maa_k, maa_r, wk_t, wr_t, wv_t)

    return out if T_pad == T else out[:, :T]


def _reference(hidden, time_maa_k, time_maa_r, w_key, w_receptance, w_value):
    B, T, H = hidden.shape
    shifted = jnp.concatenate(
        [jnp.zeros((B, 1, H), hidden.dtype), hidden[:, :-1, :]], axis=1)
    delta = shifted - hidden
    key_in = hidden + delta * time_maa_k
    rec_in = hidden + delta * time_maa_r
    key = jnp.maximum(key_in @ w_key.T, 0.0) ** 2
    value = key @ w_value.T
    receptance = jax.nn.sigmoid(rec_in @ w_receptance.T)
    return receptance * value


if __name__ == "__main__":
    # --- Test 1: bf16 weights, multi-tile time shift (NT = 2), NI = 1 --------
    B, T, H = 2, 16, 32
    I = int(H * 3.5 // 32 * 32)  # = 96, matches the module's default
    k_h, k_mk, k_mr, k_wk, k_wr, k_wv = jax.random.split(jax.random.PRNGKey(0), 6)
    hidden = jax.random.normal(k_h, (B, T, H), jnp.float32)
    time_maa_k = jax.random.uniform(k_mk, (1, 1, H), jnp.float32)
    time_maa_r = jax.random.uniform(k_mr, (1, 1, H), jnp.float32)
    w_key = jax.random.normal(k_wk, (I, H), jnp.float32) * 0.1
    w_receptance = jax.random.normal(k_wr, (H, H), jnp.float32) * 0.1
    w_value = jax.random.normal(k_wv, (H, I), jnp.float32) * 0.1

    ref = _reference(hidden, time_maa_k, time_maa_r,
                     w_key, w_receptance, w_value)
    wk_t, wr_t, wv_t = prepare_ffn_weights(w_key, w_receptance, w_value,
                                           compute_dtype=jnp.bfloat16)
    fwd = jax.jit(functools.partial(rwkv6_feed_forward, time_tile=8))
    out = jax.block_until_ready(
        fwd(hidden, time_maa_k, time_maa_r, wk_t, wr_t, wv_t))
    assert out.shape == (B, T, H)
    assert jnp.allclose(out, ref, atol=3e-2, rtol=3e-2), "bf16 kernel mismatch"

    # --- Test 2: f32 weights, ragged T (padding path), NI = 2 (I-chunk accum) -
    B2, T2, H2, I2 = 2, 13, 128, 256
    k_h, k_mk, k_mr, k_wk, k_wr, k_wv = jax.random.split(jax.random.PRNGKey(1), 6)
    hidden2 = jax.random.normal(k_h, (B2, T2, H2), jnp.float32)
    maa_k2 = jax.random.uniform(k_mk, (1, 1, H2), jnp.float32)
    maa_r2 = jax.random.uniform(k_mr, (1, 1, H2), jnp.float32)
    w_key2 = jax.random.normal(k_wk, (I2, H2), jnp.float32) * 0.05
    w_rec2 = jax.random.normal(k_wr, (H2, H2), jnp.float32) * 0.05
    w_val2 = jax.random.normal(k_wv, (H2, I2), jnp.float32) * 0.05

    ref2 = _reference(hidden2, maa_k2, maa_r2, w_key2, w_rec2, w_val2)
    wk2, wr2, wv2 = prepare_ffn_weights(w_key2, w_rec2, w_val2,
                                        compute_dtype=jnp.float32)
    fwd2 = jax.jit(functools.partial(rwkv6_feed_forward,
                                     time_tile=8, i_tile=128))
    out2 = jax.block_until_ready(
        fwd2(hidden2, maa_k2, maa_r2, wk2, wr2, wv2))
    assert out2.shape == (B2, T2, H2)
    assert jnp.allclose(out2, ref2, atol=2e-2, rtol=2e-2), "f32 kernel mismatch"

    print("KERNEL_OK")
</pallas_src>

<mosaic_0001>
module attributes {stable_mosaic.version = 11 : i64} {
  func.func @_ffn_kernel(%arg0: i32, %arg1: i32, %arg2: i32, %arg3: memref<1x8x32xf32, #tpu.memory_space<vmem>>, %arg4: memref<1x1x1x32xf32, #tpu.memory_space<vmem>>, %arg5: memref<1x32xf32, #tpu.memory_space<vmem>>, %arg6: memref<1x32xf32, #tpu.memory_space<vmem>>, %arg7: memref<32x96xbf16, #tpu.memory_space<vmem>>, %arg8: memref<32x32xbf16, #tpu.memory_space<vmem>>, %arg9: memref<96x32xbf16, #tpu.memory_space<vmem>>, %arg10: memref<1x8x32xf32, #tpu.memory_space<vmem>>, %arg11: memref<8x32xf32, #tpu.memory_space<vmem>>) attributes {dimension_semantics = [#tpu.dimension_semantics<parallel>, #tpu.dimension_semantics<parallel>, #tpu.dimension_semantics<arbitrary>], iteration_bounds = array<i64: 2, 2, 1>, scalar_prefetch = 0 : i64, scratch_operands = 1 : i64, tpu.core_type = #tpu.core_type<tc>, window_params = [{transform_indices = @transform_0, window_bounds = array<i64: 1, 8, 32>}, {transform_indices = @transform_1, window_bounds = array<i64: 1, 1, 1, 32>}, {pipeline_mode = #tpu.pipeline_mode<synchronous>, transform_indices = @transform_2, window_bounds = array<i64: 1, 32>}, {pipeline_mode = #tpu.pipeline_mode<synchronous>, transform_indices = @transform_3, window_bounds = array<i64: 1, 32>}, {pipeline_mode = #tpu.pipeline_mode<synchronous>, transform_indices = @transform_4, window_bounds = array<i64: 32, 96>}, {pipeline_mode = #tpu.pipeline_mode<synchronous>, transform_indices = @transform_5, window_bounds = array<i64: 32, 32>}, {pipeline_mode = #tpu.pipeline_mode<synchronous>, transform_indices = @transform_6, window_bounds = array<i64: 96, 32>}, {transform_indices = @transform_7, window_bounds = array<i64: 1, 8, 32>}]} {
    %c0 = arith.constant 0 : index
    %c0_0 = arith.constant 0 : index
    %c0_1 = arith.constant 0 : index
    %0 = vector.load %arg3[%c0, %c0_0, %c0_1] : memref<1x8x32xf32, #tpu.memory_space<vmem>>, vector<1x8x32xf32>
    %1 = vector.shape_cast %0 : vector<1x8x32xf32> to vector<8x32xf32>
    %c0_2 = arith.constant 0 : index
    %c0_3 = arith.constant 0 : index
    %c0_4 = arith.constant 0 : index
    %c0_5 = arith.constant 0 : index
    %2 = vector.load %arg4[%c0_2, %c0_3, %c0_4, %c0_5] : memref<1x1x1x32xf32, #tpu.memory_space<vmem>>, vector<1x1x1x32xf32>
    %3 = vector.shape_cast %2 : vector<1x1x1x32xf32> to vector<1x32xf32>
    %c1_i32 = arith.constant 1 : i32
    %4 = tpu.dynamic_rotate %1 by %c1_i32 dim 0 : vector<8x32xf32>, i32 -> vector<8x32xf32>
    %5 = tpu.iota {dimensions = array<i32: 0>} : vector<8x1xi32>
    %c0_i32 = arith.constant 0 : i32
    %6 = vector.broadcast %c0_i32 : i32 to vector<8x1xi32>
    %7 = arith.cmpi eq, %5, %6 : vector<8x1xi32>
    %8 = vector.shape_cast %7 : vector<8x1xi1> to vector<8x1xi1>
    %9 = vector.broadcast %8 : vector<8x1xi1> to vector<8x32xi1>
    %10 = vector.shape_cast %3 : vector<1x32xf32> to vector<1x32xf32>
    %11 = vector.broadcast %10 : vector<1x32xf32> to vector<8x32xf32>
    %12 = arith.select %9, %11, %4 : vector<8x32xi1>, vector<8x32xf32>
    %13 = arith.subf %12, %1 : vector<8x32xf32>
    %c0_i32_6 = arith.constant 0 : i32
    %14 = arith.cmpi eq, %arg2, %c0_i32_6 : i32
    %15 = arith.extui %14 : i1 to i32
    %c0_i32_7 = arith.constant 0 : i32
    %16 = arith.cmpi ne, %15, %c0_i32_7 : i32
    scf.if %16 {
      %cst_22 = arith.constant 0.000000e+00 : f32
      %36 = vector.broadcast %cst_22 : f32 to vector<8x32xf32>
      %c0_23 = arith.constant 0 : index
      %c0_24 = arith.constant 0 : index
      %37 = vector.load %arg11[%c0_23, %c0_24] : memref<8x32xf32, #tpu.memory_space<vmem>>, vector<8x32xf32>
      tpu.vector_store %arg11[%c0_23, %c0_24], %36 {strides = array<i32>} : memref<8x32xf32, #tpu.memory_space<vmem>>, vector<8x32xf32>,
    } else {
    }
    %c0_8 = arith.constant 0 : index
    %c0_9 = arith.constant 0 : index
    %17 = vector.load %arg5[%c0_8, %c0_9] : memref<1x32xf32, #tpu.memory_space<vmem>>, vector<1x32xf32>
    %18 = vector.broadcast %17 : vector<1x32xf32> to vector<8x32xf32>
    %19 = arith.mulf %13, %18 : vector<8x32xf32>
    %20 = arith.addf %1, %19 : vector<8x32xf32>
    %21 = arith.truncf %20 : vector<8x32xf32> to vector<8x32xbf16>
    %c0_10 = arith.constant 0 : index
    %c0_11 = arith.constant 0 : index
    %22 = vector.load %arg7[%c0_10, %c0_11] : memref<32x96xbf16, #tpu.memory_space<vmem>>, vector<32x96xbf16>
    %cst = arith.constant dense<0.000000e+00> : vector<8x96xf32>
    %23 = tpu.matmul %21, %22, %cst {dimension_numbers = #tpu.dot_dimension_numbers<[1], [0], [0], [1], [0, 0, 1, 1], [], []>} : vector<8x32xbf16>, vector<32x96xbf16>, vector<8x96xf32> -> vector<8x96xf32>
    %cst_12 = arith.constant 0.000000e+00 : f32
    %24 = vector.broadcast %cst_12 : f32 to vector<8x96xf32>
    %25 = arith.maximumf %23, %24 : vector<8x96xf32>
    %26 = arith.mulf %25, %25 : vector<8x96xf32>
    %c0_13 = arith.constant 0 : index
    %c0_14 = arith.constant 0 : index
    %27 = vector.load %arg11[%c0_13, %c0_14] : memref<8x32xf32, #tpu.memory_space<vmem>>, vector<8x32xf32>
    %28 = arith.truncf %26 : vector<8x96xf32> to vector<8x96xbf16>
    %c0_15 = arith.constant 0 : index
    %c0_16 = arith.constant 0 : index
    %29 = vector.load %arg9[%c0_15, %c0_16] : memref<96x32xbf16, #tpu.memory_space<vmem>>, vector<96x32xbf16>
    %cst_17 = arith.constant dense<0.000000e+00> : vector<8x32xf32>
    %30 = tpu.matmul %28, %29, %cst_17 {dimension_numbers = #tpu.dot_dimension_numbers<[1], [0], [0], [1], [0, 0, 1, 1], [], []>} : vector<8x96xbf16>, vector<96x32xbf16>, vector<8x32xf32> -> vector<8x32xf32>
    %31 = arith.addf %27, %30 : vector<8x32xf32>
    %c0_18 = arith.constant 0 : index
    %c0_19 = arith.constant 0 : index
    %32 = vector.load %arg11[%c0_18, %c0_19] : memref<8x32xf32, #tpu.memory_space<vmem>>, vector<8x32xf32>
    tpu.vector_store %arg11[%c0_18, %c0_19], %31 {strides = array<i32>} : memref<8x32xf32, #tpu.memory_space<vmem>>, vector<8x32xf32>,
    %c0_i32_20 = arith.constant 0 : i32
    %33 = arith.cmpi eq, %arg2, %c0_i32_20 : i32
    %34 = arith.extui %33 : i1 to i32
    %c0_i32_21 = arith.constant 0 : i32
    %35 = arith.cmpi ne, %34, %c0_i32_21 : i32
    scf.if %35 {
      %c0_22 = arith.constant 0 : index
      %c0_23 = arith.constant 0 : index
      %36 = vector.load %arg6[%c0_22, %c0_23] : memref<1x32xf32, #tpu.memory_space<vmem>>, vector<1x32xf32>
      %37 = vector.broadcast %36 : vector<1x32xf32> to vector<8x32xf32>
      %38 = arith.mulf %13, %37 : vector<8x32xf32>
      %39 = arith.addf %1, %38 : vector<8x32xf32>
      %40 = arith.truncf %39 : vector<8x32xf32> to vector<8x32xbf16>
      %c0_24 = arith.constant 0 : index
      %c0_25 = arith.constant 0 : index
      %41 = vector.load %arg8[%c0_24, %c0_25] : memref<32x32xbf16, #tpu.memory_space<vmem>>, vector<32x32xbf16>
      %cst_26 = arith.constant dense<0.000000e+00> : vector<8x32xf32>
      %42 = tpu.matmul %40, %41, %cst_26 {dimension_numbers = #tpu.dot_dimension_numbers<[1], [0], [0], [1], [0, 0, 1, 1], [], []>} : vector<8x32xbf16>, vector<32x32xbf16>, vector<8x32xf32> -> vector<8x32xf32>
      %43 = arith.negf %42 : vector<8x32xf32>
      %44 = math.exp %43 : vector<8x32xf32>
      %cst_27 = arith.constant 1.000000e+00 : f32
      %45 = vector.broadcast %cst_27 : f32 to vector<8x32xf32>
      %46 = arith.addf %45, %44 : vector<8x32xf32>
      %47 = arith.divf %45, %46 : vector<8x32xf32>
      %c0_28 = arith.constant 0 : index
      %c0_29 = arith.constant 0 : index
      %48 = vector.load %arg11[%c0_28, %c0_29] : memref<8x32xf32, #tpu.memory_space<vmem>>, vector<8x32xf32>
      %49 = arith.mulf %47, %48 : vector<8x32xf32>
      %c0_30 = arith.constant 0 : index
      %c0_31 = arith.constant 0 : index
      %c0_32 = arith.constant 0 : index
      %50 = vector.load %arg10[%c0_30, %c0_31, %c0_32] : memref<1x8x32xf32, #tpu.memory_space<vmem>>, vector<1x8x32xf32>
      %51 = vector.shape_cast %50 : vector<1x8x32xf32> to vector<8x32xf32>
      %52 = vector.shape_cast %49 : vector<8x32xf32> to vector<1x8x32xf32>
      tpu.vector_store %arg10[%c0_30, %c0_31, %c0_32], %52 {strides = array<i32>} : memref<1x8x32xf32, #tpu.memory_space<vmem>>, vector<1x8x32xf32>,
    } else {
    }
    return
  }
  func.func @transform_0(%arg0: i32, %arg1: i32, %arg2: i32) -> (i32, i32, i32) {
    %c0_i32 = arith.constant 0 : i32
    %c0_i32_0 = arith.constant 0 : i32
    return %arg0, %arg1, %c0_i32 : i32, i32, i32
  }
  func.func @transform_1(%arg0: i32, %arg1: i32, %arg2: i32) -> (i32, i32, i32, i32) {
    %c0_i32 = arith.constant 0 : i32
    %c0_i32_0 = arith.constant 0 : i32
    %c0_i32_1 = arith.constant 0 : i32
    return %arg0, %arg1, %c0_i32, %c0_i32_0 : i32, i32, i32, i32
  }
  func.func @transform_2(%arg0: i32, %arg1: i32, %arg2: i32) -> (i32, i32) {
    %c0_i32 = arith.constant 0 : i32
    %c0_i32_0 = arith.constant 0 : i32
    %c0_i32_1 = arith.constant 0 : i32
    return %c0_i32, %c0_i32_0 : i32, i32
  }
  func.func @transform_3(%arg0: i32, %arg1: i32, %arg2: i32) -> (i32, i32) {
    %c0_i32 = arith.constant 0 : i32
    %c0_i32_0 = arith.constant 0 : i32
    %c0_i32_1 = arith.constant 0 : i32
    return %c0_i32, %c0_i32_0 : i32, i32
  }
  func.func @transform_4(%arg0: i32, %arg1: i32, %arg2: i32) -> (i32, i32) {
    %c0_i32 = arith.constant 0 : i32
    %c0_i32_0 = arith.constant 0 : i32
    return %c0_i32, %arg2 : i32, i32
  }
  func.func @transform_5(%arg0: i32, %arg1: i32, %arg2: i32) -> (i32, i32) {
    %c0_i32 = arith.constant 0 : i32
    %c0_i32_0 = arith.constant 0 : i32
    %c0_i32_1 = arith.constant 0 : i32
    return %c0_i32, %c0_i32_0 : i32, i32
  }
  func.func @transform_6(%arg0: i32, %arg1: i32, %arg2: i32) -> (i32, i32) {
    %c0_i32 = arith.constant 0 : i32
    %c0_i32_0 = arith.constant 0 : i32
    return %arg2, %c0_i32 : i32, i32
  }
  func.func @transform_7(%arg0: i32, %arg1: i32, %arg2: i32) -> (i32, i32, i32) {
    %c0_i32 = arith.constant 0 : i32
    %c0_i32_0 = arith.constant 0 : i32
    return %arg0, %arg1, %c0_i32 : i32, i32, i32
  }
}

</mosaic_0001>

<bundles_post_ra>
// kernel: rwkv6_feed_forward.1
= control target key start
LH: loop header
LB: loop body
LE: loop exit
PB: predicated region body
PF: predicated region fallthrough
CT: control target
= control target key end

     0   :  { %s1278_s0 = inlined_call_operand.vmem [shape: f32[2,16,32], index: 0, kind: input, shape index: {}]   ;;  %s1279_s1 = inlined_call_operand.vmem [shape: f32[2,2,1,32], index: 1, kind: input, shape index: {}]   ;;  %s1280_s2 = inlined_call_operand.vmem [shape: f32[1,32], index: 2, kind: input, shape index: {}]   ;;  %s1281_s3 = inlined_call_operand.vmem [shape: f32[1,32], index: 3, kind: input, shape index: {}]   ;;  %s1282_s4 = inlined_call_operand.vmem [shape: bf16[32,96], index: 4, kind: input, shape index: {}]   ;;  %s1283_s5 = inlined_call_operand.vmem [shape: bf16[32,32], index: 5, kind: input, shape index: {}]   ;;  %s1284_s6 = inlined_call_operand.vmem [shape: bf16[96,32], index: 6, kind: input, shape index: {}]   ;;  %s1285_s7 = inlined_call_operand.hbm [shape: f32[2,16,32], index: 7, kind: output, shape index: {}]  }
   0x1   :  { %1289 = sst [smem:[#allocation9_spill]] %s1282_s4 }
   0x2   :  { %12 = vsyncpa [#allocation4], 0 }
   0x3   :  { %14 = vsyncpa [#allocation4 + $0x1], 0  ;;  %s1094_s24 = smov 0   ;;  %s1096_s25 = smov 0  }
   0x4   :  { %s1098_s26 = smov 0   ;;  %s1100_s27 = smov 0  }
   0x5   :  { %s1102_s28 = smov 0   ;;  %s1104_s29 = smov 0  }
   0x6   :  { %s1106_s30 = smov 0   ;;  %s1108_s8 = smov 0  }
   0x7 LB: > { %1290 = sst [smem:[#allocation6_spill]] %s1045_s30  ;;  %s790_s9 = sadd.s32 4294967295, %s1049_s8   ;;  %s1049_s8 = sphi %s1108_s8, %s20_s8   ;;  %s1045_s30 = sphi %s1106_s30, %s1298_s30   ;;  %s1041_s29 = sphi %s1104_s29, %s1303_s29   ;;  %s1037_s28 = sphi %s1102_s28, %s1296_s28   ;;  %s1033_s27 = sphi %s1100_s27, %s1302_s27   ;;  %s1029_s26 = sphi %s1098_s26, %s1301_s26   ;;  %s1025_s25 = sphi %s1096_s25, %s1300_s25   ;;  %s1021_s24 = sphi %s1094_s24, %s1299_s24  }
   0x8   : > { %s791_s10 = sadd.s32 4294967294, %s1049_s8   ;;  %s35_s11 = sadd.s32 1, %s1041_s29 }
   0x9   : > { %p37_p0 = scmp.ge.s32.totalorder %s35_s11, 2  ;;  %s39_s12 = sadd.s32 1, %s1045_s30 }
   0xa   : > { %p229_p1 = scmp.ne.s32.totalorder %s1029_s26, %s1025_s25  ;;  %p230_p2 = scmp.eq.s32.totalorder %s790_s9, 3 }
   0xb   : > { %s1305_s11 = smov (%p37_p0, %s35_s11), 0  ;;  %s1307_s12 = smov (!%p37_p0, %s39_s12), %s1045_s30 }
   0xc   : > { %1291 = sst [smem:[#allocation7_spill]] %s1305_s11  ;;  %s215_s13 = ssub.s32 %s1041_s29, %s1305_s11 }
   0xd   : > { %p1145_p3 = por %p230_p2, %p229_p1  ;;  %p41_p4 = scmp.ge.s32.totalorder %s1307_s12, 2 }
   0xe   : > { %p235_p5 = scmp.ne.s32.totalorder %s1025_s25, %s1021_s24  ;;  %p236_p6 = scmp.eq.s32.totalorder %s791_s10, 3 }
   0xf   : > { %p796_p7 = scmp.ge.s32.totalorder %s1049_s8, 1  ;;  %s1309_s12 = smov (%p41_p4, %s1307_s12), 0 }
  0x10   : > { %1293 = sst [smem:[#allocation8_spill]] %s1309_s12  ;;  %p1154_p8 = por %p236_p6, %p235_p5 }
  0x11   : > { %p300_p9 = scmp.lt.s32.totalorder %s1049_s8, 5  ;;  %s214_s16 = ssub.s32 %s1045_s30, %s1309_s12 }
  0x12   : > { %s219_s17 = sadd.s32 1, %s1029_s26  ;;  %s216_s18 = sor.u32 %s215_s13, %s214_s16 }
  0x13   : > { %p301_p10 = pnand %p796_p7, %p300_p9  ;;  %p217_p11 = scmp.eq.s32.totalorder %s216_s18, 0 }
  0x14   : > { %s1295_s4 = sld [smem:[#allocation9_spill]] (!%p301_p10)  ;;  %v1051_v1 = vmov (!%p301_p10), 0.0   ;;  %v380_v2 = vlaneseq (!%p301_p10)  ;;  %vm1052_vm0 = vmmov (!%p301_p10), 0   ;;  %p351_p12 = scmp.lt.s32.totalorder (!%p301_p10), %s1037_s28, 1  ;;  %vm397_vm1 = vcmask (!%p301_p10), 261120   ;;  %v944_v4 = vld [vmem:[%s1284_s6] sm:$0xff] (!%p301_p10)  }
  0x15   : > { %s1163_s19 = scalar_select %p217_p11, %s1029_s26, %s219_s17  }
  0x16   : > { %304 = sbr.rel (%p301_p10) target bundleno = 503 (0x1f7), region = 48  ;;  %836 = vmatprep.subr.bf16.mxu0 (!%p301_p10), %v1051_v1  ;;  %844 = vmatprep.subr.bf16.mxu1 (!%p301_p10), %v1051_v1  ;;  %p353_p13 = scmp.lt.s32.totalorder (!%p301_p10), %s1033_s27, 1  ;;  %398 = vst.msk [vmem:[#allocation2] sm:$0xff] (!%p301_p10), %vm397_vm1, %v1051_v1  ;;  %v381_v5 = vshrl.u32 (!%p301_p10), %v380_v2, 7  ;;  %v946_v6 = vld [vmem:[%s1284_s6 + $0x8] sm:$0xff] (!%p301_p10)   ;;  %v947_v8 = vld [vmem:[%s1284_s6 + $0x10] sm:$0xff] (!%p301_p10)  }
  0x17   : > { %840 = vmatprep.mubr.msk.bf16.mxu0 (!%p301_p10), %vm1052_vm0, %v1051_v1  ;;  %856 = vmatprep.mubr.msk.bf16.mxu1 (!%p301_p10), %vm1052_vm0, %v1051_v1  ;;  %v802_v12 = vld [vmem:[%s1280_s2] ss:$0 sm:$0xff] (!%p301_p10)  ;;  %v948_v14 = vld [vmem:[%s1284_s6 + $0x18] sm:$0xff] (!%p301_p10)   ;;  %v945_v22 = vld [vmem:[%s1283_s5 + $0x8] sm:$0xff] (!%p301_p10)   ;;  %vm521_vm3 = vcmask (!%p301_p10), 785408   ;;  %s1053_s23 = smov (!%p301_p10), [#allocation3]  }
  0x18   : > { %845 = vmatpush3.bf16.msra.mxu1 (!%p301_p10), %v944_v4  ;;  %vm382_vm2 = vcmp.eq.s32.totalorder (!%p301_p10), %v381_v5, 0  ;;  %v813_v15 = vld [vmem:[%s1281_s3] ss:$0 sm:$0xff] (!%p301_p10)  ;;  %v950_v25 = vld [vmem:[%s1284_s6 + $0x28] sm:$0xff] (!%p301_p10)   ;;  %s959_s10 = sshll.u32 (!%p301_p10), %s1053_s23, 4  ;;  %s960_s10 = int_to_ptr.vmem [resolvable:$false] %s959_s10 }
  0x19   : > { %846 = vmatprep.subr.bf16.mxu1 (!%p301_p10), %v1051_v1  ;;  %v943_v19 = vld [vmem:[%s1283_s5] sm:$0xff] (!%p301_p10)  }
  0x1a   : > { %v941_v0 = vld [vmem:[%s1295_s4] sm:$0xff] (!%p301_p10)   ;;  %v942_v3 = vld [vmem:[%s1295_s4 + $0x8] sm:$0xff] (!%p301_p10)   ;;  %s819_s4 = sshll.u32 (!%p301_p10), %s1037_s28, 1 }
  0x1b   : > { %837 = vmatpush3.bf16.msra.mxu0 (!%p301_p10), %v941_v0  ;;  %v949_v24 = vld [vmem:[%s1284_s6 + $0x20] sm:$0xff] (!%p301_p10)   ;;  %s660_s11 = sadd.s32 (!%p301_p10), %s1033_s27, %s819_s4 }
  0x1c   : > { %838 = vmatprep.subr.bf16.mxu0 (!%p301_p10), %v1051_v1  ;;  %847 = vmatpush3.bf16.msra.mxu1 (!%p301_p10), %v946_v6 }
  0x1d   : > { %s352_s9 = scalar_select %p351_p12, %s1037_s28, 1  ;;  %848 = vmatprep.subr.bf16.mxu1 %v1051_v1  ;;  %v471_v40 = vld [vmem:[#allocation2] sm:$0xff] }
  0x1e   : > { %s354_s16 = scalar_select %p353_p13, %s1033_s27, 1 }
  0x1f   : > { %839 = vmatpush3.bf16.msra.mxu0 %v942_v3  ;;  %s798_s17 = sshll.u32 %s352_s9, 1 }
  0x20   : > { %s356_s21 = sadd.s32 %s798_s17, %s354_s16  ;;  %860 = vmatprep.subr.bf16.mxu0 %v1051_v1  ;;  %849 = vmatpush3.bf16.msra.mxu1 %v947_v8  ;;  %s348_s16 = sand.u32 1, %s1025_s25  }
  0x21   : > { %s799_s22 = sshll.u32 %s356_s21, 3  ;;  %s365_s12 = scalar_lea.vmem %s1279_s1, %s356_s21  ;;  %850 = vmatprep.subr.bf16.mxu1 %v1051_v1 }
  0x22   : > { %s358_s13 = scalar_lea.vmem %s1278_s0, %s799_s22  ;;  %v801_v7 = vld [vmem:[%s365_s12] ss:$0 sm:$0xff]  ;;  %s797_s17 = sshll.u32 %s348_s16, 3 }
  0x23   : > { %v377_v9 = vld [vmem:[%s358_s13] sm:$0xff]  ;;  %s820_s12 = sshll.u32 %s660_s11, 7  ;;  %s350_s18 = scalar_lea.vmem [#allocation3], %s797_s17 }
  0x24   : > { %v379_v10 = vrot.slane %v377_v9, 7  ;;  %851 = vmatpush3.bf16.msra.mxu1 %v948_v14  ;;  %s664_s30 = sshll.u32 %s350_s18, 4  ;;  %s1224_s22 = scalar_lea.hbm %s1285_s7, %s820_s12  ;;  %s1226_s30 = int_to_ptr.vmem [resolvable:$true] %s664_s30 }
  0x25   : > { %852 = vmatprep.subr.bf16.mxu1 %v1051_v1  ;;  %s649_s28 = scalar_lea.sflag [#allocation4], %s348_s16  ;;  %s955_s27 = scalar_lea.vmem %s1226_s30, 128 }
  0x26   : > { %v391_v11 = vsel %vm382_vm2, %v801_v7, %v379_v10  ;;  %p956_p0 = scmp.ne.s32.totalorder %s1226_s30, %s955_s27  ;;  %s961_s13 = scalar_lea.vmem %s960_s10, 256 }
  0x27   : > { %v392_v13 = vsub.f32 %v391_v11, %v377_v9  ;;  %p962_p4 = scmp.lt.s32.totalorder %s1226_s30, %s960_s10  ;;  %p963_p5 = scmp.lt.s32.totalorder %s961_s13, %s955_s27 }
  0x28   : > { %853 = vmatpush3.bf16.msra.mxu1 %v949_v24  ;;  %p957_p1 = pnand %p956_p0, %p1145_p3 }
  0x29   : > { %v406_v16 = vmul.f32 %v802_v12, %v392_v13  ;;  %v577_v18 = vmul.f32 %v813_v15, %v392_v13  ;;  %854 = vmatprep.subr.bf16.mxu1 %v1051_v1  ;;  %p964_p6 = por %p963_p5, %p962_p4 }
  0x2a   : > { %p958_p2 = pneg %p957_p1 }
  0x2b   : > { %v407_v17 = vadd.f32 %v406_v16, %v377_v9  ;;  %v578_v21 = vadd.f32 %v577_v18, %v377_v9 }
  0x2c   : > { %855 = vmatpush3.bf16.msra.mxu1 %v950_v25  ;;  %p965_p7 = pnand %p964_p6, %p958_p2 }
  0x2d   : > { %v408_v20 = vpack.c.bf16 %v407_v17, %v407_v17  ;;  %v579_v23 = vpack.c.bf16 %v578_v21, %v578_v21 }
  0x2f   : > { %841 = vmatmul.mubr.msk.bf16.vlgmr.msra.gmra.mrb[0].mxu0 %vm397_vm1, %v408_v20 }
  0x30   : > { %861 = vmatpush3.bf16.msra.mxu0 %v943_v19  ;;  %864 = vmatprep.mubr.msk.bf16.mxu0 %vm1052_vm0, %v1051_v1 }
  0x31   : > { %862 = vmatprep.subr.bf16.mxu0 %v1051_v1 }
  0x34   : > { %863 = vmatpush3.bf16.msra.mxu0 %v945_v22 }
  0x37   : > { %865 = vmatmul.mubr.msk.bf16.vlgmr.msra.gmra.mrb[4].mxu0 %vm397_vm1, %v579_v23 }
 0x102   : > { %v463_v26 = vpop.f32.mrb[0].mxu0 }
 0x103   : > { %v469_v27 = vmax.f32 %v463_v26, 0.0  ;;  %v842_v28 = vpop.f32.mrb[1].mxu0 }
 0x104   : > { %v466_v29 = vpop.f32.mrb[2].mxu0 }
 0x105   : > { %v470_v30 = vmul.f32 %v469_v27, %v469_v27  ;;  %v843_v31 = vpop.f32.mrb[3].mxu0 }
 0x107   : > { %v472_v32 = vpack.c.bf16 %v470_v30, %v470_v30 }
 0x109   : > { %857 = vmatmul.mubr.msk.bf16.vlgmr.msra.gmra.mrb[0].mxu1 %vm521_vm3, %v472_v32 }
 0x10a   : > { %v633_v33 = vpop.f32.mrb[4].mxu0 }
 0x10b   : > { %v866_v34 = vpop.f32.mrb[5].mxu0  ;;  %v817_v37 = vmul.f32 -1.442695, %v633_v33 }
 0x10c   : > { %v636_v35 = vpop.f32.mrb[6].mxu0 }
 0x10d   : > { %v867_v36 = vpop.f32.mrb[7].mxu0  ;;  %951 = vpow2.f32 %v817_v37 }
 0x117   : > { %v952_v38 = vpop.eup %951 }
 0x118   : > { %v642_v39 = vadd.f32 1.0, %v952_v38 }
 0x11a   : > { %953 = vrcp.f32 %v642_v39 }
 0x124   : > { %v954_v46 = vpop.eup %953 }
 0x1dc   : > { %v559_v41 = vpop.f32.mrb[0].mxu1 }
 0x1dd   : > { %v565_v42 = vadd.f32 %v559_v41, %v471_v40  ;;  %v858_v43 = vpop.f32.mrb[1].mxu1 }
 0x1de   : > { %v562_v44 = vpop.f32.mrb[2].mxu1 }
 0x1df   : > { %566 = vst.msk [vmem:[#allocation2] sm:$0xff] %vm397_vm1, %v565_v42  ;;  %v859_v45 = vpop.f32.mrb[3].mxu1 }
 0x1e6   : > { %v645_v47 = vld [vmem:[#allocation2] sm:$0xff] }
 0x1e7   : > { %v646_v48 = vmul.f32 %v954_v46, %v645_v47 }
 0x1e9   : > { %647 = vst.msk [vmem:[%s350_s18] sm:$0xff] %vm397_vm1, %v646_v48 }
 0x1ea   : > { %968 = shalt.err (!%p965_p7)
}
 0x1eb   : > { %s969_s9 = scalar_lea.hbm %s1224_s22, 128  ;;  %s973_s4 = scalar_lea.hbm %s1285_s7, 512 }
 0x1ec   : > { %p970_p9 = scmp.ne.s32.totalorder %s1224_s22, %s969_s9  ;;  %p974_p12 = scmp.lt.u32.totalorder %s1224_s22, %s1285_s7 }
 0x1ed   : > { %p975_p13 = scmp.lt.u32.totalorder %s973_s4, %s969_s9  ;;  %p977_p1 = scmp.lt.u32.totalorder %s969_s9, %s1224_s22 }
 0x1ee   : > { %p971_p10 = pnand %p970_p9, %p1145_p3 }
 0x1ef   : > { %p976_p0 = por %p975_p13, %p974_p12 }
 0x1f0   : > { %p972_p11 = pneg %p971_p10 }
 0x1f1   : > { %p978_p2 = por %p977_p1, %p976_p0 }
 0x1f3   : > { %p979_p4 = pnand %p978_p2, %p972_p11 }
 0x1f5   : > { %982 = shalt.err (!%p979_p4)
}
 0x1f6   : > { %868 = dma.vmem_to_hbm [thread:$0]  (%p1145_p3), %s1226_s30, 128, %s1224_s22, %s649_s28  }
 0x1f7 PF: > { %p874_p5 = scmp.ge.s32.totalorder %s1049_s8, 2  ;;  %s676_s18 = sand.u32 1, %s1021_s24  }
 0x1f8   : > { %s677_s20 = scalar_lea.sflag [#allocation4], %s676_s18 }
 0x1f9   : > { %p871_p6 = pnand %p874_p5, %p1154_p8 }
 0x1fb   : > { %1016 = dma.done.wait (!%p871_p6), %s677_s20, 128  }
 0x1fc   : > { %1018 = vsyncadd (!%p871_p6), %s677_s20, 4294967168  ;;  %s20_s8 = sadd.s32 1, %s1049_s8   ;;  %s1296_s28 = sld [smem:[#allocation6_spill]] }
 0x1fd   : > { %p17_p7 = scmp.ge.s32.totalorder %s20_s8, 6   ;;  %s1297_s14 = sld [smem:[#allocation7_spill]] }
 0x1fe   : > { %s1298_s30 = sld [smem:[#allocation8_spill]]  ;;  %s1299_s24 = smov %s1025_s25 }
 0x1ff   : > { %s1300_s25 = smov %s1029_s26  ;;  %s1301_s26 = smov %s1163_s19 }
 0x200   : > { %s1302_s27 = smov %s1041_s29  ;;  %19 = sbr.rel (!%p17_p7) target bundleno = 7 (0x7), region = 100 }
 0x203   : > { %s1303_s29 = smov %s1297_s14 }
 0x207   :  { %682 = vsyncpa [#allocation4], 1 }
 0x208   :  { %684 = vsyncpa [#allocation4 + $0x1], 1 }

</bundles_post_ra>
